<compile_context>
chip_gen: v7x
topology: tpu7x:2x2x1
jax: 0.10.0
libtpu: 0.0.40
codegen_flags: <defaults>
</compile_context>

<pallas_src>
import math

import jax
import jax.numpy as jnp
import numpy as np
from jax import lax
from jax.experimental import pallas as pl
from jax.experimental.pallas import tpu as pltpu


def _round_up(v, m):
    return (v + m - 1) // m * m


def _scale_kernel(c_ref, w_ref, scale_ref):
    # c_ref: (1, 1) scalar in SMEM; w_ref: (out_p, in_p); scale_ref: (1, in_p) f32
    c = c_ref[0, 0].astype(jnp.float32)
    # numerically stable softplus (lipschitz_c may be 1e5 -> exp overflows otherwise)
    softplus_c = jnp.maximum(c, 0.0) + jnp.log1p(jnp.exp(-jnp.abs(c)))
    absrowsum = jnp.sum(jnp.abs(w_ref[...].astype(jnp.float32)), axis=0,
                        keepdims=True)                               # (1, in_p)
    # zero-padded columns give absrowsum == 0 -> inf -> clamped to 1 (harmless;
    # matches PyTorch edge-case behavior since softplus_c > 0).
    scale_ref[...] = jnp.minimum(softplus_c / absrowsum, 1.0)


def _matmul_kernel(scale_ref, x_ref, w_ref, b_ref, o_ref):
    # scale_ref: (1, in_p) f32 (resident); x_ref: (TM, in_p); w_ref: (out_p, in_p)
    # (resident); b_ref: (1, out_p) (resident); o_ref: (TM, out_p)
    x = x_ref[...]
    # Fold the per-input-feature scale into x (== scaling W's columns), then
    # round back to the compute dtype so the MXU sees native-dtype operands.
    x_scaled = (x.astype(jnp.float32) * scale_ref[...]).astype(x.dtype)
    w = w_ref[...]
    if w.dtype != x.dtype:           # static (trace-time) dtype check
        w = w.astype(x.dtype)
    y = lax.dot_general(
        x_scaled, w,
        dimension_numbers=(((1,), (1,)), ((), ())),   # contract shared last dim
        preferred_element_type=jnp.float32)           # (TM, out_p), f32 accumulate
    o_ref[...] = (y + b_ref[...].astype(jnp.float32)).astype(o_ref.dtype)


def lipschitz_linear_forward(x, weight, bias, lipschitz_c):
    """x: (..., in_features). Returns (y: (..., out_features), lipschitz_c)."""
    out_features, in_features = weight.shape
    lead_shape = x.shape[:-1]
    m = int(np.prod(lead_shape)) if lead_shape else 1
    out_dtype = x.dtype

    # Pad feature dims to full lanes (128) for lane-dense loads / unmasked stores.
    in_p = _round_up(in_features, 128)
    out_p = _round_up(out_features, 128)

    x2d = x.reshape(m, in_features)
    w_p = weight
    if (out_p, in_p) != (out_features, in_features):
        w_p = jnp.pad(weight, ((0, out_p - out_features), (0, in_p - in_features)))
    if bias is None:
        b_p = jnp.zeros((1, out_p), out_dtype)
    else:
        b_p = jnp.pad(bias, (0, out_p - out_features)).reshape(1, out_p)

    x_item = jnp.dtype(x.dtype).itemsize
    w_bytes = out_p * in_p * jnp.dtype(weight.dtype).itemsize

    # Row tile: largest power of two <= 1024 whose double-buffered x/out tiles
    # plus the resident weight stay under a conservative VMEM budget (v7x-safe).
    # TODO(synk): add K/N tiling if the weight itself ever exceeds the budget.
    budget = 40 * 1024 * 1024
    tm = 1024
    while tm > 8 and 2 * tm * (in_p + out_p) * x_item + w_bytes > budget:
        tm //= 2
    tm = max(tm, 8)
    if m <= tm:
        tm = _round_up(m, 8)
    m_p = _round_up(m, tm)

    if (m_p, in_p) != (m, in_features):
        x2d = jnp.pad(x2d, ((0, m_p - m), (0, in_p - in_features)))

    vmem_needed = (2 * tm * (in_p + out_p) * x_item + w_bytes
                   + 4 * (in_p + out_p) * 4)
    vmem_limit = int(min(max(vmem_needed * 5 // 4 + (4 << 20), 32 << 20), 56 << 20))

    c_smem = jnp.asarray(lipschitz_c, jnp.float32).reshape(1, 1)

    # Kernel 1: per-input-feature Lipschitz scale, computed exactly once.
    scale = pl.pallas_call(
        _scale_kernel,
        out_shape=jax.ShapeDtypeStruct((1, in_p), jnp.float32),
        grid_spec=pltpu.PrefetchScalarGridSpec(
            num_scalar_prefetch=0,
            grid=(1,),
            in_specs=[
                pl.BlockSpec(memory_space=pltpu.SMEM),                   # lipschitz_c
                pl.BlockSpec((out_p, in_p), lambda i: (0, 0)),           # weight
            ],
            out_specs=pl.BlockSpec((1, in_p), lambda i: (0, 0)),
        ),
        compiler_params=pltpu.CompilerParams(vmem_limit_bytes=vmem_limit),
    )(c_smem, w_p)

    # Kernel 2: M-tiled matmul with the scale folded into x.
    y2d = pl.pallas_call(
        _matmul_kernel,
        out_shape=jax.ShapeDtypeStruct((m_p, out_p), out_dtype),
        grid_spec=pltpu.PrefetchScalarGridSpec(
            num_scalar_prefetch=0,
            grid=(m_p // tm,),
            in_specs=[
                pl.BlockSpec((1, in_p), lambda i: (0, 0)),        # scale (resident)
                pl.BlockSpec((tm, in_p), lambda i: (i, 0)),       # x tile (pipelined)
                pl.BlockSpec((out_p, in_p), lambda i: (0, 0)),    # weight (resident)
                pl.BlockSpec((1, out_p), lambda i: (0, 0)),       # bias (resident)
            ],
            out_specs=pl.BlockSpec((tm, out_p), lambda i: (i, 0)),
        ),
        compiler_params=pltpu.CompilerParams(
            dimension_semantics=("parallel",),
            vmem_limit_bytes=vmem_limit,
        ),
    )(scale, x2d, w_p, b_p)

    y = y2d[:m, :out_features].reshape(*lead_shape, out_features)
    return y, lipschitz_c


def _reference_forward(x, weight, bias, lipschitz_c):
    softplus_c = jax.nn.softplus(lipschitz_c)
    absrowsum = jnp.abs(weight).sum(axis=0)
    scale = jnp.minimum(softplus_c / absrowsum, 1.0)
    w_norm = weight * scale[None, :]
    return x @ w_norm.T + bias


if __name__ == "__main__":
    in_features = 32
    out_features = 16
    lipschitz_init = 100000.0

    key = jax.random.PRNGKey(0)
    k_w, k_b, k_x = jax.random.split(key, 3)

    # kaiming_uniform_(a=sqrt(5)) on a (out, in) weight -> U(-1/sqrt(in), 1/sqrt(in))
    bound_w = 1.0 / math.sqrt(in_features)
    weight = jax.random.uniform(
        k_w, (out_features, in_features), jnp.float32, -bound_w, bound_w)
    bound_b = 1.0 / math.sqrt(in_features)
    bias = jax.random.uniform(k_b, (out_features,), jnp.float32, -bound_b, bound_b)
    lipschitz_c = jnp.asarray(lipschitz_init, jnp.float32)

    # input: (*, H_in) — use (2, 8, 32)
    x = jax.random.normal(k_x, (2, 8, in_features), jnp.float32)

    y, c_out = lipschitz_linear_forward(x, weight, bias, lipschitz_c)
    y = jax.block_until_ready(y)

    y_ref = _reference_forward(x.reshape(-1, in_features), weight, bias, lipschitz_c)
    y_ref = y_ref.reshape(2, 8, out_features)
    np.testing.assert_allclose(np.asarray(y), np.asarray(y_ref), rtol=1e-5, atol=1e-5)

    print("KERNEL_OK")
</pallas_src>

<mosaic_0001>
module attributes {stable_mosaic.version = 11 : i64} {
  func.func @_scale_kernel(%arg0: i32, %arg1: memref<1x1xf32, #tpu.memory_space<smem>>, %arg2: memref<128x128xf32, #tpu.memory_space<vmem>>, %arg3: memref<1x128xf32, #tpu.memory_space<vmem>>) attributes {dimension_semantics = [#tpu.dimension_semantics<arbitrary>], iteration_bounds = array<i64: 1>, scalar_prefetch = 0 : i64, scratch_operands = 0 : i64, tpu.core_type = #tpu.core_type<tc>, window_params = [{transform_indices = @transform_0, window_bounds = array<i64: 1, 1>}, {pipeline_mode = #tpu.pipeline_mode<synchronous>, transform_indices = @transform_1, window_bounds = array<i64: 128, 128>}, {pipeline_mode = #tpu.pipeline_mode<synchronous>, transform_indices = @transform_2, window_bounds = array<i64: 1, 128>}]} {
    %c0 = arith.constant 0 : index
    %c0_0 = arith.constant 0 : index
    %0 = memref.load %arg1[%c0, %c0_0] : memref<1x1xf32, #tpu.memory_space<smem>>
    %cst = arith.constant 0.000000e+00 : f32
    %1 = arith.maximumf %0, %cst : f32
    %2 = math.absf %0 : f32
    %cst_1 = arith.constant 0.000000e+00 : f32
    %3 = arith.subf %cst_1, %2 : f32
    %4 = math.exp %3 : f32
    %5 = math.log1p %4 : f32
    %6 = arith.addf %1, %5 : f32
    %c0_2 = arith.constant 0 : index
    %c0_3 = arith.constant 0 : index
    %7 = vector.load %arg2[%c0_2, %c0_3] : memref<128x128xf32, #tpu.memory_space<vmem>>, vector<128x128xf32>
    %8 = math.absf %7 : vector<128x128xf32>
    %cst_4 = arith.constant dense<0.000000e+00> : vector<128xf32>
    %9 = vector.multi_reduction <add>, %8, %cst_4 [0] : vector<128x128xf32> to vector<128xf32>
    %10 = vector.shape_cast %9 : vector<128xf32> to vector<1x128xf32>
    %11 = vector.broadcast %6 : f32 to vector<1x128xf32>
    %12 = arith.divf %11, %10 : vector<1x128xf32>
    %cst_5 = arith.constant 1.000000e+00 : f32
    %13 = vector.broadcast %cst_5 : f32 to vector<1x128xf32>
    %14 = arith.minimumf %12, %13 : vector<1x128xf32>
    %c0_6 = arith.constant 0 : index
    %c0_7 = arith.constant 0 : index
    %15 = vector.load %arg3[%c0_6, %c0_7] : memref<1x128xf32, #tpu.memory_space<vmem>>, vector<1x128xf32>
    tpu.vector_store %arg3[%c0_6, %c0_7], %14 {strides = array<i32>} : memref<1x128xf32, #tpu.memory_space<vmem>>, vector<1x128xf32>,
    return
  }
  func.func @transform_0(%arg0: i32) -> (i32, i32) {
    %c0_i32 = arith.constant 0 : i32
    %c0_i32_0 = arith.constant 0 : i32
    %c0_i32_1 = arith.constant 0 : i32
    return %c0_i32, %c0_i32_0 : i32, i32
  }
  func.func @transform_1(%arg0: i32) -> (i32, i32) {
    %c0_i32 = arith.constant 0 : i32
    %c0_i32_0 = arith.constant 0 : i32
    %c0_i32_1 = arith.constant 0 : i32
    return %c0_i32, %c0_i32_0 : i32, i32
  }
  func.func @transform_2(%arg0: i32) -> (i32, i32) {
    %c0_i32 = arith.constant 0 : i32
    %c0_i32_0 = arith.constant 0 : i32
    %c0_i32_1 = arith.constant 0 : i32
    return %c0_i32, %c0_i32_0 : i32, i32
  }
}

</mosaic_0001>

<bundles_post_ra>
// kernel: tpu_custom_call.1
= control target key start
LH: loop header
LB: loop body
LE: loop exit
PB: predicated region body
PF: predicated region fallthrough
CT: control target
= control target key end

     0   :  { %8 = vsyncpa [#allocation4], 0  ;;  %s233_s0 = inlined_call_operand.<no memory space> [shape: f32[1,1], index: 0, kind: input, shape index: {}]   ;;  %s234_s1 = inlined_call_operand.hbm [shape: f32[128,128], index: 1, kind: input, shape index: {}]   ;;  %s235_s2 = inlined_call_operand.hbm [shape: f32[1,128], index: 2, kind: output, shape index: {}]  }
   0x1   :  { %9 = vsyncpa [#allocation5], 0  ;;  %s183_s9 = smov [#allocation3]   ;;  %s135_s13 = scalar_lea.hbm %s234_s1, 2048 }
   0x2   :  { %s17_s10 = sshll.u32 %s183_s9, 4  ;;  %p136_p0 = scmp.ne.s32.totalorder %s234_s1, %s135_s13  ;;  %s18_s10 = int_to_ptr.vmem [resolvable:$true] %s17_s10 }
   0x3   :  { %p139_p1 = scmp.lt.u32.totalorder %s135_s13, %s234_s1 }
   0x5   :  { %p141_p2 = pnand %p139_p1, %p136_p0 }
   0x7   :  { %144 = shalt.err (!%p141_p2)
}
   0x8   :  { %s145_s18 = scalar_lea.vmem %s18_s10, 2048  ;;  %p150_p4 = scmp.lt.s32.totalorder %s18_s10, %s18_s10 }
   0x9   :  { %p146_p3 = scmp.ne.s32.totalorder %s18_s10, %s145_s18  ;;  %p151_p5 = scmp.lt.s32.totalorder %s145_s18, %s145_s18 }
   0xb   :  { %p152_p6 = por %p151_p5, %p150_p4 }
   0xd   :  { %p153_p7 = pnand %p152_p6, %p146_p3 }
   0xf   :  { %156 = shalt.err (!%p153_p7)
}
  0x10   :  { %s184_s19 = smov 128   ;;  %s185_s20 = smov 8  }
  0x11   :  { %23 = dma.hbm_to_vmem [thread:$0]  %s234_s1, 2048, %s18_s10, [#allocation4], %s184_s19, %s184_s19, %s185_s20  }
  0x12   :  { %s29_s25 = sand.u32 2147483647, %s233_s0 }
  0x13   :  { %179 = dma.done.wait [#allocation4], 2048  }
  0x14   :  { %180 = vsyncadd [#allocation4], 4294965248  ;;  %s30_s26 = ssub.f32 0.0, %s29_s25  ;;  %v47_v3 = vld [vmem:[#allocation3] sm:$0xff]  ;;  %v48_v4 = vld [vmem:[#allocation3 + $0x8] sm:$0xff]  ;;  %s186_s27 = smov 0.0  }
  0x15   :  { %v63_v5 = vand.u32 2147483647, %v47_v3  ;;  %v64_v6 = vand.u32 2147483647, %v48_v4  ;;  %v49_v7 = vld [vmem:[#allocation3 + $0x10] sm:$0xff]  ;;  %v50_v10 = vld [vmem:[#allocation3 + $0x18] sm:$0xff]  ;;  %s28_s30 = smax.f32 %s186_s27, %s233_s0 }
  0x16   :  { %v31_v0 = vstv %s30_s26  ;;  %v65_v8 = vand.u32 2147483647, %v49_v7  ;;  %v66_v11 = vand.u32 2147483647, %v50_v10  ;;  %v51_v13 = vld [vmem:[#allocation3 + $0x20] sm:$0xff]  ;;  %v52_v16 = vld [vmem:[#allocation3 + $0x28] sm:$0xff] }
  0x17   :  { %v32_v1 = vmul.f32 1.442695, %v31_v0  ;;  %v79_v9 = vadd.f32 %v64_v6, %v63_v5  ;;  %v67_v14 = vand.u32 2147483647, %v51_v13  ;;  %v68_v17 = vand.u32 2147483647, %v52_v16 }
  0x18   :  { %v53_v19 = vld [vmem:[#allocation3 + $0x30] sm:$0xff]  ;;  %v54_v22 = vld [vmem:[#allocation3 + $0x38] sm:$0xff]  ;;  %v55_v25 = vld [vmem:[#allocation3 + $0x40] sm:$0xff]  ;;  %s187_s5 = smov [#allocation6]  }
  0x19   :  { %129 = vpow2.f32 %v32_v1  ;;  %v80_v12 = vadd.f32 %v79_v9, %v65_v8  ;;  %v69_v20 = vand.u32 2147483647, %v53_v19  ;;  %v70_v23 = vand.u32 2147483647, %v54_v22  ;;  %v56_v28 = vld [vmem:[#allocation3 + $0x48] sm:$0xff]  ;;  %v57_v33 = vld [vmem:[#allocation3 + $0x50] sm:$0xff] }
  0x1a   :  { %v71_v26 = vand.u32 2147483647, %v55_v25  ;;  %v72_v31 = vand.u32 2147483647, %v56_v28  ;;  %v73_v34 = vand.u32 2147483647, %v57_v33 }
  0x1b   :  { %v81_v15 = vadd.f32 %v80_v12, %v66_v11  ;;  %v58_v37 = vld [vmem:[#allocation3 + $0x58] sm:$0xff]  ;;  %v59_v41 = vld [vmem:[#allocation3 + $0x60] sm:$0xff]  ;;  %v60_v48 = vld [vmem:[#allocation3 + $0x68] sm:$0xff]  ;;  %s111_s6 = sshll.u32 %s187_s5, 4  ;;  %s112_s6 = int_to_ptr.vmem [resolvable:$true] %s111_s6 }
  0x1c   :  { %v74_v38 = vand.u32 2147483647, %v58_v37  ;;  %v75_v44 = vand.u32 2147483647, %v59_v41  ;;  %v76_v50 = vand.u32 2147483647, %v60_v48  ;;  %p162_p9 = scmp.lt.s32.totalorder %s112_s6, %s112_s6 }
  0x1d   :  { %v82_v18 = vadd.f32 %v81_v15, %v67_v14  ;;  %v61_v52 = vld [vmem:[#allocation3 + $0x70] sm:$0xff]  ;;  %v62_v55 = vld [vmem:[#allocation3 + $0x78] sm:$0xff]  ;;  %s157_s7 = scalar_lea.vmem %s112_s6, 16  ;;  %s161_s8 = scalar_lea.vmem %s112_s6, 32 }
  0x1e   :  { %v77_v53 = vand.u32 2147483647, %v61_v52  ;;  %v78_v56 = vand.u32 2147483647, %v62_v55  ;;  %p158_p8 = scmp.ne.s32.totalorder %s112_s6, %s157_s7  ;;  %p163_p10 = scmp.lt.s32.totalorder %s161_s8, %s157_s7 }
  0x1f   :  { %v83_v21 = vadd.f32 %v82_v18, %v68_v17 }
  0x20   :  { %p164_p11 = por %p163_p10, %p162_p9 }
  0x21   :  { %v84_v24 = vadd.f32 %v83_v21, %v69_v20 }
  0x22   :  { %p165_p12 = pnand %p164_p11, %p158_p8 }
  0x23   :  { %v130_v2 = vpop.eup %129  ;;  %v85_v27 = vadd.f32 %v84_v24, %v70_v23 }
  0x24   :  { %120 = vpush %v130_v2 }
  0x25   :  { %v86_v32 = vadd.f32 %v85_v27, %v71_v26 }
  0x27   :  { %v87_v35 = vadd.f32 %v86_v32, %v72_v31 }
  0x29   :  { %v88_v39 = vadd.f32 %v87_v35, %v73_v34 }
  0x2b   :  { %v89_v45 = vadd.f32 %v88_v39, %v74_v38 }
  0x2d   :  { %v90_v51 = vadd.f32 %v89_v45, %v75_v44 }
  0x2f   :  { %v91_v54 = vadd.f32 %v90_v51, %v76_v50 }
  0x31   :  { %v92_v57 = vadd.f32 %v91_v54, %v77_v53 }
  0x33   :  { %v93_v58 = vadd.f32 %v92_v57, %v78_v56 }
  0x35   :  { %v94_v59 = vrot.slane %v93_v58, 4 }
  0x37   :  { %v95_v60 = vadd.f32 %v94_v59, %v93_v58 }
  0x39   :  { %v96_v61 = vrot.slane %v95_v60, 2 }
  0x3b   :  { %v97_v62 = vadd.f32 %v96_v61, %v95_v60 }
  0x3d   :  { %v98_v63 = vrot.slane %v97_v62, 1 }
  0x3f   :  { %v99_v0 = vadd.f32 %v98_v63, %v97_v62 }
  0x55   :  { %s121_s1 = spop %120 }
  0x56   :  { %v35_v29 = vstv %s121_s1 }
  0x57   :  { %v36_v30 = vadd.f32 1.0, %v35_v29  ;;  %v39_v36 = vmul.f32 -0.5, %v35_v29  ;;  %v42_v42 = vand.u32 2147483647, %v35_v29 }
  0x59   :  { %131 = vlog2.f32 %v36_v30  ;;  %v40_v40 = vadd.f32 1.0, %v39_v36  ;;  %vm43_vm0 = vcmp.lt.f32.partialorder %v42_v42, 0.0004427343 }
  0x5a   :  { %133 = vrcp.f32 %v99_v0 }
  0x5b   :  { %v41_v46 = vmul.f32 %v40_v40, %v35_v29 }
  0x63   :  { %v132_v43 = vpop.eup %131 }
  0x64   :  { %v38_v47 = vmul.f32 0.6931472, %v132_v43  ;;  %v134_v1 = vpop.eup %133 }
  0x66   :  { %v44_v49 = vsel %vm43_vm0, %v41_v46, %v38_v47 }
  0x67   :  { %122 = vpush %v44_v49 }
  0x98   :  { %s123_s3 = spop %122 }
  0x99   :  { %s46_s4 = sadd.f32 %s123_s3, %s28_s30 }
  0x9b   :  { %v100_v2 = vstv %s46_s4 }
  0x9c   :  { %v102_v3 = vmul.f32 %v134_v1, %v100_v2 }
  0x9e   :  { %v103_v4 = vmin.f32 %v102_v3, 1.0 }
  0xa0   :  { %104 = vst [vmem:[#allocation6] sm:$0x1] %v103_v4 }
  0xa1   :  { %168 = shalt.err (!%p165_p12)
}
  0xa2   :  { %s169_s10 = scalar_lea.hbm %s235_s2, 16 }
  0xa3   :  { %p170_p13 = scmp.ne.s32.totalorder %s235_s2, %s169_s10  ;;  %p173_p0 = scmp.lt.u32.totalorder %s169_s10, %s235_s2 }
  0xa5   :  { %p175_p1 = pnand %p173_p0, %p170_p13 }
  0xa7   :  { %178 = shalt.err (!%p175_p1)
}
  0xa8   :  { %114 = dma.vmem_to_hbm [thread:$0]  %s112_s6, 16, %s235_s2, [#allocation5]  }
  0xa9   :  { %181 = dma.done.wait [#allocation5], 16  }
  0xaa   :  { %182 = vsyncadd [#allocation5], 4294967280 }
  0xab   :  { %118 = vsyncpa [#allocation4], 1 }
  0xac   :  { %119 = vsyncpa [#allocation5], 1 }

</bundles_post_ra>
